<compile_context>
chip_gen: v7x
topology: tpu7x:2x2x1
jax: 0.10.0
libtpu: 0.0.40
codegen_flags: <defaults>
</compile_context>

<pallas_src>
import functools

import jax
import jax.numpy as jnp
from jax.experimental import pallas as pl
from jax.experimental.pallas import tpu as pltpu


def _round_up(x, m):
    return pl.cdiv(x, m) * m


# ----------------------------------------------------------------------------
# Pallas kernel: fused (char-embedding gather + Conv1d taps) + max-over-time
# ----------------------------------------------------------------------------
def char_cnn_kernel(taps_ref, m_ref, b_ref, o_ref):
    # taps_ref: [K, tn, T]  int32   taps[k, n, t] = char index at word n, pos t+k
    # m_ref:    [K, V, Cp]  f32     fused tables M_k = E @ W_k (Cout padded to Cp)
    # b_ref:    [1, Cp]     f32     conv bias (padded)
    # o_ref:    [tn, Cp]    f32     max-over-time pooled conv output
    n_taps, tn, t_out = taps_ref.shape
    _, vocab, _ = m_ref.shape

    # Hoisted lane-iota (JAX does not CSE broadcasts inside the loop).
    iota_v = jax.lax.broadcasted_iota(jnp.int32, (tn, t_out, vocab), 2)

    acc = None
    # K is small and static -> unrolled python loop of MXU matmuls.
    for k in range(n_taps):
        idx_k = taps_ref[k]                                   # [tn, T] int32
        oh = (idx_k[:, :, None] == iota_v).astype(jnp.float32)  # [tn, T, V]
        contrib = jax.lax.dot_general(                        # gather+conv tap
            oh, m_ref[k], (((2,), (0,)), ((), ())),
            preferred_element_type=jnp.float32)               # [tn, T, Cp]
        acc = contrib if acc is None else acc + contrib

    pooled = jnp.max(acc, axis=1)                             # [tn, Cp]
    o_ref[...] = pooled + b_ref[...]                          # bias after max


def char_cnn_maxpool_fused(chars_flat, fused_m, conv_b, *, tile_words=256):
    """chars_flat: [N, L] int32, fused_m: [K, V, Cout], conv_b: [1, Cout]
    -> [N, Cout] f32 (max-over-time char-CNN features per word)."""
    N, L = chars_flat.shape
    K, V, Cout = fused_m.shape
    T = L - K + 1

    # Lane-dense output: pad Cout up to a multiple of 128 (min 128).
    c_pad = max(128, _round_up(Cout, 128))

    # Tile size: large (amortizes ~0.35us/step grid overhead, fills MXU rows),
    # but capped so the demo / small N still tiles cleanly.  Sweep 256-512.
    tn = min(tile_words, _round_up(N, 8))
    n_pad = _round_up(N, tn)

    chars_p = jnp.pad(chars_flat, ((0, n_pad - N), (0, 0)))   # pad rows: idx 0
    # Sliding conv windows built at the index level (int32 only):
    # taps[k, n, t] = chars_p[n, t + k]
    pos = jnp.arange(T)[None, :] + jnp.arange(K)[:, None]     # [K, T]
    taps = jnp.transpose(chars_p[:, pos], (1, 0, 2))          # [K, n_pad, T]

    m_p = jnp.pad(fused_m, ((0, 0), (0, 0), (0, c_pad - Cout)))
    b_p = jnp.pad(conv_b.reshape(1, -1), ((0, 0), (0, c_pad - Cout)))

    out = pl.pallas_call(
        char_cnn_kernel,
        out_shape=jax.ShapeDtypeStruct((n_pad, c_pad), jnp.float32),
        grid_spec=pltpu.PrefetchScalarGridSpec(
            num_scalar_prefetch=0,
            grid=(n_pad // tn,),
            in_specs=[
                pl.BlockSpec((K, tn, T), lambda i: (0, i, 0)),
                pl.BlockSpec((K, V, c_pad), lambda i: (0, 0, 0)),
                pl.BlockSpec((1, c_pad), lambda i: (0, 0)),
            ],
            out_specs=pl.BlockSpec((tn, c_pad), lambda i: (i, 0)),
        ),
        compiler_params=pltpu.CompilerParams(
            dimension_semantics=("parallel",)),
    )(taps, m_p, b_p)

    return out[:N, :Cout]


# ----------------------------------------------------------------------------
# Full forward (word-emb gather + concat are glue; char path is in Pallas)
# ----------------------------------------------------------------------------
@jax.jit
def embedding_layer_forward(words, chars, params):
    # words: [sent_len, batch] int32
    # chars: [batch, sent_len, word_len] int32
    word_emb = jnp.take(params["word_emb"], words, axis=0)    # [S, B, Dw]

    B, S, L = chars.shape
    chars_flat = chars.reshape(B * S, L)

    # Fold the embedding table into the conv taps: M_k = E @ W_k  ([K, V, Cout])
    # (tiny, once-per-call parameter transform; enables streaming only int32).
    fused_m = jnp.einsum("vd,kdc->kvc", params["char_emb"], params["conv_w"])

    cnn = char_cnn_maxpool_fused(chars_flat, fused_m, params["conv_b"])
    Cout = params["conv_w"].shape[-1]
    cnn = cnn.reshape(B, S, Cout).transpose(1, 0, 2)          # [S, B, Cout]

    return jnp.concatenate([word_emb, cnn], axis=2)           # [S, B, Dw+Cout]


# ----------------------------------------------------------------------------
# Pure-JAX reference (PyTorch-faithful: gather, then Conv1d taps, then max)
# ----------------------------------------------------------------------------
def reference_forward(words, chars, params):
    word_emb = params["word_emb"][words]
    char_emb = params["char_emb"][chars]
    B, S, L, Dc = char_emb.shape
    K, Cin, Cout = params["conv_w"].shape
    T = L - K + 1
    x = char_emb.reshape(B * S, L, Dc)
    out = jnp.zeros((B * S, T, Cout), jnp.float32)
    for kk in range(K):
        out = out + jnp.einsum("ntc,co->nto", x[:, kk:kk + T, :],
                               params["conv_w"][kk])
    out = out + params["conv_b"][0]
    out = out.max(axis=1).reshape(B, S, Cout).transpose(1, 0, 2)
    return jnp.concatenate([word_emb, out], axis=2)


# ----------------------------------------------------------------------------
# Deterministic parameter construction
# ----------------------------------------------------------------------------
def make_params(key, word_input_dim, word_embedding_dim, char_input_dim,
                char_embedding_dim, char_cnn_filter_num, char_cnn_kernel_size,
                word_pad_idx, char_pad_idx):
    k1, k2, k3, k4 = jax.random.split(key, 4)
    out_channels = char_embedding_dim * char_cnn_filter_num

    word_emb = jax.random.normal(k1, (word_input_dim, word_embedding_dim),
                                 jnp.float32)
    word_emb = word_emb.at[word_pad_idx].set(0.0)             # padding_idx row

    char_emb = jax.random.normal(k2, (char_input_dim, char_embedding_dim),
                                 jnp.float32)
    char_emb = char_emb.at[char_pad_idx].set(0.0)             # padding_idx row

    fan_in = char_embedding_dim * char_cnn_kernel_size
    bound = 1.0 / jnp.sqrt(fan_in)
    # PyTorch Conv1d weight is [Cout, Cin, K]; store as [K, Cin, Cout]
    conv_w_torch = jax.random.uniform(
        k3, (out_channels, char_embedding_dim, char_cnn_kernel_size),
        jnp.float32, -bound, bound)
    conv_w = jnp.transpose(conv_w_torch, (2, 1, 0))
    conv_b = jax.random.uniform(k4, (1, out_channels), jnp.float32,
                                -bound, bound)

    return dict(word_emb=word_emb, char_emb=char_emb,
                conv_w=conv_w, conv_b=conv_b)


if __name__ == "__main__":
    # Small config consistent with the module
    word_input_dim = 100
    word_embedding_dim = 32
    char_input_dim = 50
    char_embedding_dim = 16
    char_cnn_filter_num = 4        # out_channels = 64
    char_cnn_kernel_size = 3
    word_pad_idx = 0
    char_pad_idx = 0

    batch_size = 2
    sent_len = 8
    word_len = 10

    key = jax.random.PRNGKey(0)
    kp, kw, kc = jax.random.split(key, 3)

    params = make_params(kp, word_input_dim, word_embedding_dim,
                         char_input_dim, char_embedding_dim,
                         char_cnn_filter_num, char_cnn_kernel_size,
                         word_pad_idx, char_pad_idx)

    words = jax.random.randint(kw, (sent_len, batch_size), 0, word_input_dim,
                               dtype=jnp.int32)
    chars = jax.random.randint(kc, (batch_size, sent_len, word_len), 0,
                               char_input_dim, dtype=jnp.int32)

    out = embedding_layer_forward(words, chars, params)
    out = jax.block_until_ready(out)

    ref = reference_forward(words, chars, params)
    assert out.shape == (sent_len, batch_size,
                         word_embedding_dim +
                         char_embedding_dim * char_cnn_filter_num)
    assert jnp.allclose(out, ref, atol=1e-4, rtol=1e-4), "mismatch vs reference"

    print("KERNEL_OK")
</pallas_src>

<mosaic_0001>
module attributes {stable_mosaic.version = 11 : i64} {
  func.func @char_cnn_kernel(%arg0: i32, %arg1: memref<3x16x8xi32, #tpu.memory_space<vmem>>, %arg2: memref<3x50x128xf32, #tpu.memory_space<vmem>>, %arg3: memref<1x128xf32, #tpu.memory_space<vmem>>, %arg4: memref<16x128xf32, #tpu.memory_space<vmem>>) attributes {dimension_semantics = [#tpu.dimension_semantics<parallel>], iteration_bounds = array<i64: 1>, scalar_prefetch = 0 : i64, scratch_operands = 0 : i64, tpu.core_type = #tpu.core_type<tc>, window_params = [{transform_indices = @transform_0, window_bounds = array<i64: 3, 16, 8>}, {pipeline_mode = #tpu.pipeline_mode<synchronous>, transform_indices = @transform_1, window_bounds = array<i64: 3, 50, 128>}, {pipeline_mode = #tpu.pipeline_mode<synchronous>, transform_indices = @transform_2, window_bounds = array<i64: 1, 128>}, {transform_indices = @transform_3, window_bounds = array<i64: 16, 128>}]} {
    %0 = tpu.iota {dimensions = array<i32: 2>} : vector<16x8x50xi32>
    %c0 = arith.constant 0 : index
    %c0_0 = arith.constant 0 : index
    %c0_1 = arith.constant 0 : index
    %1 = vector.load %arg1[%c0, %c0_0, %c0_1] : memref<3x16x8xi32, #tpu.memory_space<vmem>>, vector<1x16x8xi32>
    %2 = vector.shape_cast %1 : vector<1x16x8xi32> to vector<16x8xi32>
    %3 = vector.shape_cast %2 : vector<16x8xi32> to vector<16x8x1xi32>
    %4 = vector.broadcast %3 : vector<16x8x1xi32> to vector<16x8x50xi32>
    %5 = arith.cmpi eq, %4, %0 : vector<16x8x50xi32>
    %6 = arith.extui %5 : vector<16x8x50xi1> to vector<16x8x50xi32>
    %7 = arith.sitofp %6 : vector<16x8x50xi32> to vector<16x8x50xf32>
    %c0_2 = arith.constant 0 : index
    %c0_3 = arith.constant 0 : index
    %c0_4 = arith.constant 0 : index
    %8 = vector.load %arg2[%c0_2, %c0_3, %c0_4] : memref<3x50x128xf32, #tpu.memory_space<vmem>>, vector<1x50x128xf32>
    %9 = vector.shape_cast %8 : vector<1x50x128xf32> to vector<50x128xf32>
    %cst = arith.constant dense<0.000000e+00> : vector<16x8x128xf32>
    %10 = tpu.matmul %7, %9, %cst {dimension_numbers = #tpu.dot_dimension_numbers<[2], [0], [0, 1], [1], [0, 0, 0, 1, 1, 1], [], []>} : vector<16x8x50xf32>, vector<50x128xf32>, vector<16x8x128xf32> -> vector<16x8x128xf32>
    %c1 = arith.constant 1 : index
    %c0_5 = arith.constant 0 : index
    %c0_6 = arith.constant 0 : index
    %11 = vector.load %arg1[%c1, %c0_5, %c0_6] : memref<3x16x8xi32, #tpu.memory_space<vmem>>, vector<1x16x8xi32>
    %12 = vector.shape_cast %11 : vector<1x16x8xi32> to vector<16x8xi32>
    %13 = vector.shape_cast %12 : vector<16x8xi32> to vector<16x8x1xi32>
    %14 = vector.broadcast %13 : vector<16x8x1xi32> to vector<16x8x50xi32>
    %15 = arith.cmpi eq, %14, %0 : vector<16x8x50xi32>
    %16 = arith.extui %15 : vector<16x8x50xi1> to vector<16x8x50xi32>
    %17 = arith.sitofp %16 : vector<16x8x50xi32> to vector<16x8x50xf32>
    %c1_7 = arith.constant 1 : index
    %c0_8 = arith.constant 0 : index
    %c0_9 = arith.constant 0 : index
    %18 = vector.load %arg2[%c1_7, %c0_8, %c0_9] : memref<3x50x128xf32, #tpu.memory_space<vmem>>, vector<1x50x128xf32>
    %19 = vector.shape_cast %18 : vector<1x50x128xf32> to vector<50x128xf32>
    %cst_10 = arith.constant dense<0.000000e+00> : vector<16x8x128xf32>
    %20 = tpu.matmul %17, %19, %cst_10 {dimension_numbers = #tpu.dot_dimension_numbers<[2], [0], [0, 1], [1], [0, 0, 0, 1, 1, 1], [], []>} : vector<16x8x50xf32>, vector<50x128xf32>, vector<16x8x128xf32> -> vector<16x8x128xf32>
    %21 = arith.addf %10, %20 : vector<16x8x128xf32>
    %c2 = arith.constant 2 : index
    %c0_11 = arith.constant 0 : index
    %c0_12 = arith.constant 0 : index
    %22 = vector.load %arg1[%c2, %c0_11, %c0_12] : memref<3x16x8xi32, #tpu.memory_space<vmem>>, vector<1x16x8xi32>
    %23 = vector.shape_cast %22 : vector<1x16x8xi32> to vector<16x8xi32>
    %24 = vector.shape_cast %23 : vector<16x8xi32> to vector<16x8x1xi32>
    %25 = vector.broadcast %24 : vector<16x8x1xi32> to vector<16x8x50xi32>
    %26 = arith.cmpi eq, %25, %0 : vector<16x8x50xi32>
    %27 = arith.extui %26 : vector<16x8x50xi1> to vector<16x8x50xi32>
    %28 = arith.sitofp %27 : vector<16x8x50xi32> to vector<16x8x50xf32>
    %c2_13 = arith.constant 2 : index
    %c0_14 = arith.constant 0 : index
    %c0_15 = arith.constant 0 : index
    %29 = vector.load %arg2[%c2_13, %c0_14, %c0_15] : memref<3x50x128xf32, #tpu.memory_space<vmem>>, vector<1x50x128xf32>
    %30 = vector.shape_cast %29 : vector<1x50x128xf32> to vector<50x128xf32>
    %cst_16 = arith.constant dense<0.000000e+00> : vector<16x8x128xf32>
    %31 = tpu.matmul %28, %30, %cst_16 {dimension_numbers = #tpu.dot_dimension_numbers<[2], [0], [0, 1], [1], [0, 0, 0, 1, 1, 1], [], []>} : vector<16x8x50xf32>, vector<50x128xf32>, vector<16x8x128xf32> -> vector<16x8x128xf32>
    %32 = arith.addf %21, %31 : vector<16x8x128xf32>
    %cst_17 = arith.constant dense<0xFF800000> : vector<16x128xf32>
    %33 = vector.multi_reduction <maximumf>, %32, %cst_17 [1] : vector<16x8x128xf32> to vector<16x128xf32>
    %c0_18 = arith.constant 0 : index
    %c0_19 = arith.constant 0 : index
    %34 = vector.load %arg3[%c0_18, %c0_19] : memref<1x128xf32, #tpu.memory_space<vmem>>, vector<1x128xf32>
    %35 = vector.broadcast %34 : vector<1x128xf32> to vector<16x128xf32>
    %36 = arith.addf %33, %35 : vector<16x128xf32>
    %c0_20 = arith.constant 0 : index
    %c0_21 = arith.constant 0 : index
    %37 = vector.load %arg4[%c0_20, %c0_21] : memref<16x128xf32, #tpu.memory_space<vmem>>, vector<16x128xf32>
    tpu.vector_store %arg4[%c0_20, %c0_21], %36 {strides = array<i32>} : memref<16x128xf32, #tpu.memory_space<vmem>>, vector<16x128xf32>,
    return
  }
  func.func @transform_0(%arg0: i32) -> (i32, i32, i32) {
    %c0_i32 = arith.constant 0 : i32
    %c0_i32_0 = arith.constant 0 : i32
    %c0_i32_1 = arith.constant 0 : i32
    return %c0_i32, %arg0, %c0_i32_0 : i32, i32, i32
  }
  func.func @transform_1(%arg0: i32) -> (i32, i32, i32) {
    %c0_i32 = arith.constant 0 : i32
    %c0_i32_0 = arith.constant 0 : i32
    %c0_i32_1 = arith.constant 0 : i32
    %c0_i32_2 = arith.constant 0 : i32
    return %c0_i32, %c0_i32_0, %c0_i32_1 : i32, i32, i32
  }
  func.func @transform_2(%arg0: i32) -> (i32, i32) {
    %c0_i32 = arith.constant 0 : i32
    %c0_i32_0 = arith.constant 0 : i32
    %c0_i32_1 = arith.constant 0 : i32
    return %c0_i32, %c0_i32_0 : i32, i32
  }
  func.func @transform_3(%arg0: i32) -> (i32, i32) {
    %c0_i32 = arith.constant 0 : i32
    %c0_i32_0 = arith.constant 0 : i32
    return %arg0, %c0_i32 : i32, i32
  }
}

</mosaic_0001>

<bundles_post_ra>
// kernel: embedding_layer_forward.1
= control target key start
LH: loop header
LB: loop body
LE: loop exit
PB: predicated region body
PF: predicated region fallthrough
CT: control target
= control target key end

     0   :  { %v14_v0 = vlaneseq  ;;  %vm405_vm0 = vcmask 1041408   ;;  %vm356_vm1 = vcmask 408576   ;;  %s2168_s0 = inlined_call_operand.vmem [shape: s32[3,16,8], index: 0, kind: input, shape index: {}]   ;;  %s2169_s1 = inlined_call_operand.vmem [shape: f32[3,50,128], index: 1, kind: input, shape index: {}]   ;;  %s2170_s2 = inlined_call_operand.vmem [shape: f32[1,128], index: 2, kind: input, shape index: {}]   ;;  %s2171_s3 = inlined_call_operand.vmem [shape: f32[16,128], index: 3, kind: output, shape index: {}]  }
   0x1   :  { %v1714_v2 = vld [vmem:[%s2168_s0] sm:$0xff]  ;;  %v1723_v5 = vld [vmem:[%s2168_s0 + $0x10] sm:$0xff]  ;;  %v1740_v12 = vld [vmem:[%s2168_s0 + $0x28] sm:$0xff] }
   0x2   :  { %v19_v1 = vshrl.u32 %v14_v0, 7  ;;  %v1745_v13 = vld [vmem:[%s2168_s0 + $0x8] sm:$0xff]  ;;  %v178_v23 = vld [vmem:[%s2169_s1] sm:$0xff]  ;;  %v1345_v29 = vld [vmem:[%s2169_s1 + $0x38] sm:$0xff] }
   0x3   :  { %v179_v24 = vld [vmem:[%s2169_s1 + $0x8] sm:$0xff]  ;;  %v1346_v30 = vld [vmem:[%s2169_s1 + $0x40] sm:$0xff]  ;;  %v180_v31 = vld [vmem:[%s2169_s1 + $0x10] sm:$0xff] }
   0x4   :  { %v1716_v3 = vsub.s32 1, %v19_v1  ;;  %v1718_v4 = vsub.s32 0, %v19_v1  ;;  %v1733_v10 = vsub.s32 2, %v19_v1  ;;  %v1735_v11 = vsub.s32 3, %v19_v1  ;;  %v181_v36 = vld [vmem:[%s2169_s1 + $0x18] sm:$0xff]  ;;  %v1347_v37 = vld [vmem:[%s2169_s1 + $0x48] sm:$0xff] }
   0x5   :  { %v1751_v16 = vsub.s32 4, %v19_v1  ;;  %v1753_v17 = vsub.s32 5, %v19_v1  ;;  %v1755_v18 = vsub.s32 6, %v19_v1  ;;  %v1788_v32 = vsub.s32 7, %v19_v1  ;;  %v1348_v38 = vld [vmem:[%s2169_s1 + $0x50] sm:$0xff]  ;;  %v182_v50 = vld [vmem:[%s2169_s1 + $0x20] sm:$0xff] }
   0x6   :  { %v28_v6 = vrot.slane %v1714_v2, %v1716_v3  ;;  %v21_v7 = vrot.slane %v1714_v2, %v1718_v4  ;;  %v198_v8 = vrot.slane %v1723_v5, %v1716_v3  ;;  %v191_v9 = vrot.slane %v1723_v5, %v1718_v4  ;;  %v183_v53 = vld [vmem:[%s2169_s1 + $0x28] sm:$0xff]  ;;  %v1349_v54 = vld [vmem:[%s2169_s1 + $0x58] sm:$0xff]  ;;  %v1350_v55 = vld [vmem:[%s2169_s1 + $0x60] sm:$0xff] }
   0x7   :  { %v205_v14 = vrot.slane %v1723_v5, %v1733_v10  ;;  %v35_v15 = vrot.slane %v1714_v2, %v1733_v10  ;;  %v212_v19 = vrot.slane %v1723_v5, %v1735_v11  ;;  %v42_v20 = vrot.slane %v1714_v2, %v1735_v11  ;;  %v1853_v60 = vld [vmem:[%s2169_s1 + $0x30] sm:$0x3]  ;;  %v1351_v63 = vld [vmem:[%s2169_s1 + $0x68] sm:$0x3] }
   0x8   :  { %30 = vbcast.lane.b32.xlu1 %v28_v6, 256  ;;  %23 = vbcast.lane.b32.xlu0 %v21_v7, 256  ;;  %v812_v21 = vrot.slane %v1740_v12, %v1718_v4  ;;  %v77_v22 = vrot.slane %v1745_v13, %v1718_v4  ;;  %v819_v25 = vrot.slane %v1740_v12, %v1716_v3  ;;  %v1404_v1 = vld [vmem:[%s2169_s1 + $0x70] sm:$0xff]  ;;  %v1405_v6 = vld [vmem:[%s2169_s1 + $0x78] sm:$0xff] }
   0x9   :  { %v84_v26 = vrot.slane %v1745_v13, %v1716_v3  ;;  %v826_v27 = vrot.slane %v1740_v12, %v1733_v10  ;;  %v91_v28 = vrot.slane %v1745_v13, %v1733_v10  ;;  %v833_v33 = vrot.slane %v1740_v12, %v1735_v11 }
   0xa   :  { %v98_v34 = vrot.slane %v1745_v13, %v1735_v11  ;;  %v840_v35 = vrot.slane %v1740_v12, %v1751_v16  ;;  %v105_v39 = vrot.slane %v1745_v13, %v1751_v16  ;;  %v847_v40 = vrot.slane %v1740_v12, %v1753_v17 }
   0xb   :  { %v112_v41 = vrot.slane %v1745_v13, %v1753_v17  ;;  %v854_v42 = vrot.slane %v1740_v12, %v1755_v18  ;;  %v119_v43 = vrot.slane %v1745_v13, %v1755_v18  ;;  %v861_v44 = vrot.slane %v1740_v12, %v1788_v32 }
   0xc   :  { %200 = vbcast.lane.b32.xlu1 %v198_v8, 256  ;;  %193 = vbcast.lane.b32.xlu0 %v191_v9, 256  ;;  %v126_v45 = vrot.slane %v1745_v13, %v1788_v32  ;;  %v1819_v46 = vpack.c.bf16 %v179_v24, %v178_v23  ;;  %v1612_v47 = vpack.c.bf16 %v1346_v30, %v1345_v29  ;;  %v1689_v12 = vmov 0.0  }
   0xd   :  { %v1821_v48 = vpack.c.bf16 %v181_v36, %v180_v31  ;;  %v1616_v49 = vpack.c.bf16 %v1348_v38, %v1347_v37  ;;  %v219_v51 = vrot.slane %v1723_v5, %v1751_v16  ;;  %v49_v52 = vrot.slane %v1714_v2, %v1751_v16 }
   0xe   :  { %1625 = vmatprep.subr.bf16.mxu0 %v1819_v46  ;;  %1613 = vmatprep.subr.bf16.mxu1 %v1612_v47  ;;  %v1842_v56 = vpack.c.bf16 %v183_v53, %v182_v50  ;;  %v1620_v57 = vpack.c.bf16 %v1350_v55, %v1349_v54  ;;  %v226_v58 = vrot.slane %v1723_v5, %v1753_v17 }
   0xf   :  { %1627 = vmatpush3.bf16.msra.mxu0 %v1819_v46  ;;  %1615 = vmatpush3.bf16.msra.mxu1 %v1612_v47  ;;  %v56_v59 = vrot.slane %v1714_v2, %v1753_v17  ;;  %v233_v61 = vrot.slane %v1723_v5, %v1755_v18  ;;  %v63_v62 = vrot.slane %v1714_v2, %v1755_v18 }
  0x10   :  { %207 = vbcast.lane.b32.xlu1 %v205_v14, 256  ;;  %37 = vbcast.lane.b32.xlu0 %v35_v15, 256  ;;  %v1872_v7 = vpack.c.bf16 %v1405_v6, %v1404_v1  ;;  %v240_v8 = vrot.slane %v1723_v5, %v1788_v32  ;;  %v70_v9 = vrot.slane %v1714_v2, %v1788_v32  ;;  %v1386_v14 = vld [vmem:[%s2168_s0 + $0x20] sm:$0xff]  ;;  %v1328_v15 = vld [vmem:[%s2168_s0 + $0x18] sm:$0xff] }
  0x11   :  { %1629 = vmatprep.subr.bf16.mxu0 %v1821_v48  ;;  %1617 = vmatprep.subr.bf16.mxu1 %v1616_v49  ;;  %v756_v2 = vrot.slane %v1386_v14, %v1718_v4  ;;  %v247_v5 = vrot.slane %v1328_v15, %v1718_v4  ;;  %v770_v23 = vrot.slane %v1386_v14, %v1733_v10  ;;  %v1406_v4 = vld [vmem:[%s2169_s1 + $0x80] sm:$0xff] }
  0x12   :  { %v261_v24 = vrot.slane %v1328_v15, %v1733_v10  ;;  %v777_v29 = vrot.slane %v1386_v14, %v1735_v11  ;;  %v268_v30 = vrot.slane %v1328_v15, %v1735_v11  ;;  %v784_v31 = vrot.slane %v1386_v14, %v1751_v16  ;;  %v1407_v10 = vld [vmem:[%s2169_s1 + $0x88] sm:$0xff] }
  0x13   :  { %1631 = vmatpush3.bf16.msra.mxu0 %v1821_v48  ;;  %1619 = vmatpush3.bf16.msra.mxu1 %v1616_v49  ;;  %v275_v36 = vrot.slane %v1328_v15, %v1751_v16  ;;  %v791_v37 = vrot.slane %v1386_v14, %v1753_v17  ;;  %v282_v38 = vrot.slane %v1328_v15, %v1753_v17 }
  0x14   :  { %214 = vbcast.lane.b32.xlu1 %v212_v19, 256  ;;  %44 = vbcast.lane.b32.xlu0 %v42_v20, 256  ;;  %v763_v19 = vrot.slane %v1386_v14, %v1716_v3  ;;  %v254_v20 = vrot.slane %v1328_v15, %v1716_v3  ;;  %v798_v47 = vrot.slane %v1386_v14, %v1755_v18  ;;  %v1954_v3 = vand.u32 127, %v14_v0 }
  0x15   :  { %1633 = vmatprep.subr.bf16.mxu0 %v1842_v56  ;;  %1621 = vmatprep.subr.bf16.mxu1 %v1620_v57  ;;  %v289_v49 = vrot.slane %v1328_v15, %v1755_v18  ;;  %v805_v50 = vrot.slane %v1386_v14, %v1788_v32  ;;  %v1640_v17 = vpack.c.bf16 %v1407_v10, %v1406_v4  ;;  %v1408_v18 = vld [vmem:[%s2169_s1 + $0x90] sm:$0xff] }
  0x17   :  { %1635 = vmatpush3.bf16.msra.mxu0 %v1842_v56  ;;  %1623 = vmatpush3.bf16.msra.mxu1 %v1620_v57 }
  0x18   :  { %221 = vbcast.lane.b32.xlu1 %v219_v51, 256  ;;  %51 = vbcast.lane.b32.xlu0 %v49_v52, 256  ;;  %v296_v51 = vrot.slane %v1328_v15, %v1788_v32 }
  0x19   :  { %1548 = vmatprep.subr.msk.mxu0 %vm405_vm0, %v1853_v60  ;;  %1510 = vmatprep.subr.msk.mxu1 %vm405_vm0, %v1351_v63 }
  0x1b   :  { %1549 = vmatpush3.msk.msra.mxu0 %vm405_vm0, %v1853_v60  ;;  %1511 = vmatpush3.msk.msra.mxu1 %vm405_vm0, %v1351_v63 }
  0x1c   :  { %228 = vbcast.lane.b32.xlu1 %v226_v58, 256  ;;  %58 = vbcast.lane.b32.xlu0 %v56_v59, 256 }
  0x1d   :  { %1637 = vmatprep.subr.bf16.mxu0 %v1872_v7  ;;  %1648 = vmatprep.subr.bf16.mxu1 %v1819_v46 }
  0x20   :  { %235 = vbcast.lane.b32.xlu1 %v233_v61, 256  ;;  %65 = vbcast.lane.b32.xlu0 %v63_v62, 256 }
  0x24   :  { %242 = vbcast.lane.b32.xlu1 %v240_v8, 256  ;;  %72 = vbcast.lane.b32.xlu0 %v70_v9, 256 }
  0x28   :  { %758 = vbcast.lane.b32.xlu1 %v756_v2, 256  ;;  %249 = vbcast.lane.b32.xlu0 %v247_v5, 256 }
  0x2c   :  { %765 = vbcast.lane.b32.xlu1 %v763_v19, 256  ;;  %256 = vbcast.lane.b32.xlu0 %v254_v20, 256 }
  0x30   :  { %772 = vbcast.lane.b32.xlu1 %v770_v23, 256  ;;  %263 = vbcast.lane.b32.xlu0 %v261_v24, 256 }
  0x34   :  { %779 = vbcast.lane.b32.xlu1 %v777_v29, 256  ;;  %270 = vbcast.lane.b32.xlu0 %v268_v30, 256 }
  0x38   :  { %786 = vbcast.lane.b32.xlu1 %v784_v31, 256  ;;  %277 = vbcast.lane.b32.xlu0 %v275_v36, 256 }
  0x3c   :  { %793 = vbcast.lane.b32.xlu1 %v791_v37, 256  ;;  %284 = vbcast.lane.b32.xlu0 %v282_v38, 256 }
  0x40   :  { %800 = vbcast.lane.b32.xlu1 %v798_v47, 256  ;;  %291 = vbcast.lane.b32.xlu0 %v289_v49, 256 }
  0x44   :  { %807 = vbcast.lane.b32.xlu1 %v805_v50, 256  ;;  %298 = vbcast.lane.b32.xlu0 %v296_v51, 256 }
  0x48   :  { %814 = vbcast.lane.b32.xlu1 %v812_v21, 256  ;;  %79 = vbcast.lane.b32.xlu0 %v77_v22, 256  ;;  %v1409_v21 = vld [vmem:[%s2169_s1 + $0x98] sm:$0xff] }
  0x4c   :  { %821 = vbcast.lane.b32.xlu1 %v819_v25, 256  ;;  %86 = vbcast.lane.b32.xlu0 %v84_v26, 256 }
  0x50   :  { %828 = vbcast.lane.b32.xlu1 %v826_v27, 256  ;;  %93 = vbcast.lane.b32.xlu0 %v91_v28, 256  ;;  %v1644_v28 = vpack.c.bf16 %v1409_v21, %v1408_v18 }
  0x54   :  { %835 = vbcast.lane.b32.xlu1 %v833_v33, 256  ;;  %100 = vbcast.lane.b32.xlu0 %v98_v34, 256 }
  0x58   :  { %842 = vbcast.lane.b32.xlu1 %v840_v35, 256  ;;  %107 = vbcast.lane.b32.xlu0 %v105_v39, 256  ;;  %v1410_v39 = vld [vmem:[%s2169_s1 + $0xa0] sm:$0x3] }
  0x5c   :  { %849 = vbcast.lane.b32.xlu1 %v847_v40, 256  ;;  %114 = vbcast.lane.b32.xlu0 %v112_v41, 256 }
  0x60   :  { %856 = vbcast.lane.b32.xlu1 %v854_v42, 256  ;;  %121 = vbcast.lane.b32.xlu0 %v119_v43, 256 }
  0x64   :  { %863 = vbcast.lane.b32.xlu1 %v861_v44, 256  ;;  %128 = vbcast.lane.b32.xlu0 %v126_v45, 256 }
  0x7a   :  { %v31_v11 = vpop.permute.xlu1 %30  ;;  %v24_v16 = vpop.permute.xlu0 %23 }
  0x7b   :  { %vm131_vm2 = vcmp.eq.s32.totalorder %v31_v11, %v1954_v3  ;;  %vm130_vm3 = vcmp.eq.s32.totalorder %v24_v16, %v1954_v3 }
  0x7c   :  { %v1312_v13 = vsel %vm131_vm2, 1.0, %v1689_v12  ;;  %v1311_v0 = vsel %vm130_vm3, 1.0, %v1689_v12 }
  0x7d   :  { %1550 = vmatprep.mubr.msk.f32.mxu0 %vm356_vm1, %v1311_v0 }
  0x7e   :  { %v201_v22 = vpop.permute.xlu1 %200  ;;  %1551 = vmatmul.mubr.msk.f32.vlgmr.msra.gmra.mrb[0].mxu0 %vm356_vm1, %v1312_v13  ;;  %v194_v25 = vpop.permute.xlu0 %193 }
  0x7f   :  { %vm301_vm4 = vcmp.eq.s32.totalorder %v201_v22, %v1954_v3  ;;  %vm300_vm5 = vcmp.eq.s32.totalorder %v194_v25, %v1954_v3  ;;  %1639 = vmatpush3.bf16.msra.mxu0 %v1872_v7 }
  0x80   :  { %v1330_v26 = vsel %vm301_vm4, 1.0, %v1689_v12  ;;  %v1329_v27 = vsel %vm300_vm5, 1.0, %v1689_v12  ;;  %1641 = vmatprep.subr.bf16.mxu0 %v1640_v17 }
  0x81   :  { %1512 = vmatprep.mubr.msk.f32.mxu1 %vm356_vm1, %v1329_v27 }
  0x82   :  { %v208_v32 = vpop.permute.xlu1 %207  ;;  %1513 = vmatmul.mubr.msk.f32.vlgmr.msra.gmra.mrb[0].mxu1 %vm356_vm1, %v1330_v26  ;;  %v38_v33 = vpop.permute.xlu0 %37 }
  0x83   :  { %vm302_vm6 = vcmp.eq.s32.totalorder %v208_v32, %v1954_v3  ;;  %vm132_vm7 = vcmp.eq.s32.totalorder %v38_v33, %v1954_v3  ;;  %1643 = vmatpush3.bf16.msra.mxu0 %v1640_v17  ;;  %1652 = vmatpush3.bf16.msra.mxu1 %v1819_v46 }
  0x84   :  { %v1331_v34 = vsel %vm302_vm6, 1.0, %v1689_v12  ;;  %v1313_v35 = vsel %vm132_vm7, 1.0, %v1689_v12  ;;  %1645 = vmatprep.subr.bf16.mxu0 %v1644_v28  ;;  %1649 = vmatprep.subr.bf16.mxu1 %v1821_v48 }
  0x85   :  { %1515 = vmatprep.mubr.msk.f32.mxu1 %vm356_vm1, %v1331_v34  ;;  %1553 = vmatprep.mubr.msk.f32.mxu0 %vm356_vm1, %v1313_v35 }
  0x86   :  { %v215_v40 = vpop.permute.xlu1 %214  ;;  %v45_v41 = vpop.permute.xlu0 %44 }
  0x87   :  { %vm303_vm8 = vcmp.eq.s32.totalorder %v215_v40, %v1954_v3  ;;  %vm133_vm9 = vcmp.eq.s32.totalorder %v45_v41, %v1954_v3  ;;  %1647 = vmatpush3.bf16.msra.mxu0 %v1644_v28  ;;  %1653 = vmatpush3.bf16.msra.mxu1 %v1821_v48 }
  0x88   :  { %v1332_v42 = vsel %vm303_vm8, 1.0, %v1689_v12  ;;  %v1314_v43 = vsel %vm133_vm9, 1.0, %v1689_v12  ;;  %1586 = vmatprep.subr.msk.mxu0 %vm405_vm0, %v1410_v39  ;;  %1650 = vmatprep.subr.bf16.mxu1 %v1842_v56 }
  0x89   :  { %1516 = vmatmul.mubr.msk.f32.gmra.mrb[2].mxu1 %vm356_vm1, %v1332_v42  ;;  %1554 = vmatmul.mubr.msk.f32.gmra.mrb[2].mxu0 %vm356_vm1, %v1314_v43 }
  0x8a   :  { %v222_v44 = vpop.permute.xlu1 %221  ;;  %v52_v45 = vpop.permute.xlu0 %51 }
  0x8b   :  { %vm304_vm10 = vcmp.eq.s32.totalorder %v222_v44, %v1954_v3  ;;  %vm134_vm11 = vcmp.eq.s32.totalorder %v52_v45, %v1954_v3  ;;  %1587 = vmatpush3.msk.msra.mxu0 %vm405_vm0, %v1410_v39  ;;  %1654 = vmatpush3.bf16.msra.mxu1 %v1842_v56 }
  0x8c   :  { %v1333_v46 = vsel %vm304_vm10, 1.0, %v1689_v12  ;;  %v1315_v48 = vsel %vm134_vm11, 1.0, %v1689_v12  ;;  %1651 = vmatprep.subr.msk.mxu1 %vm405_vm0, %v1853_v60 }
  0x8d   :  { %1518 = vmatprep.mubr.msk.f32.mxu1 %vm356_vm1, %v1333_v46  ;;  %1556 = vmatprep.mubr.msk.f32.mxu0 %vm356_vm1, %v1315_v48 }
  0x8e   :  { %v229_v52 = vpop.permute.xlu1 %228  ;;  %v59_v53 = vpop.permute.xlu0 %58 }
  0x8f   :  { %vm305_vm12 = vcmp.eq.s32.totalorder %v229_v52, %v1954_v3  ;;  %vm135_vm13 = vcmp.eq.s32.totalorder %v59_v53, %v1954_v3  ;;  %1655 = vmatpush3.msk.msra.mxu1 %vm405_vm0, %v1853_v60 }
  0x90   :  { %v1334_v54 = vsel %vm305_vm12, 1.0, %v1689_v12  ;;  %v1316_v55 = vsel %vm135_vm13, 1.0, %v1689_v12 }
  0x91   :  { %1519 = vmatmul.mubr.msk.f32.gmra.mrb[4].mxu1 %vm356_vm1, %v1334_v54  ;;  %1557 = vmatmul.mubr.msk.f32.gmra.mrb[4].mxu0 %vm356_vm1, %v1316_v55 }
  0x92   :  { %v236_v56 = vpop.permute.xlu1 %235  ;;  %v66_v57 = vpop.permute.xlu0 %65 }
  0x93   :  { %vm306_vm14 = vcmp.eq.s32.totalorder %v236_v56, %v1954_v3  ;;  %vm136_vm15 = vcmp.eq.s32.totalorder %v66_v57, %v1954_v3 }
  0x94   :  { %v1335_v58 = vsel %vm306_vm14, 1.0, %v1689_v12  ;;  %v1317_v59 = vsel %vm136_vm15, 1.0, %v1689_v12 }
  0x95   :  { %1521 = vmatprep.mubr.msk.f32.mxu1 %vm356_vm1, %v1335_v58  ;;  %1559 = vmatprep.mubr.msk.f32.mxu0 %vm356_vm1, %v1317_v59 }
  0x96   :  { %v243_v60 = vpop.permute.xlu1 %242  ;;  %v73_v61 = vpop.permute.xlu0 %72 }
  0x97   :  { %vm307_vm0 = vcmp.eq.s32.totalorder %v243_v60, %v1954_v3  ;;  %vm137_vm2 = vcmp.eq.s32.totalorder %v73_v61, %v1954_v3 }
  0x98   :  { %v1336_v62 = vsel %vm307_vm0, 1.0, %v1689_v12  ;;  %v1318_v63 = vsel %vm137_vm2, 1.0, %v1689_v12 }
  0x99   :  { %1522 = vmatmul.mubr.msk.f32.gmra.mrb[6].mxu1 %vm356_vm1, %v1336_v62  ;;  %1560 = vmatmul.mubr.msk.f32.gmra.mrb[6].mxu0 %vm356_vm1, %v1318_v63 }
  0x9a   :  { %v759_v1 = vpop.permute.xlu1 %758  ;;  %v250_v6 = vpop.permute.xlu0 %249 }
  0x9b   :  { %vm865_vm3 = vcmp.eq.s32.totalorder %v759_v1, %v1954_v3  ;;  %vm308_vm4 = vcmp.eq.s32.totalorder %v250_v6, %v1954_v3 }
  0x9c   :  { %v1388_v7 = vsel %vm865_vm3, 1.0, %v1689_v12  ;;  %v1337_v8 = vsel %vm308_vm4, 1.0, %v1689_v12 }
  0x9d   :  { %1524 = vmatprep.mubr.msk.f32.mxu1 %vm356_vm1, %v1337_v8  ;;  %1588 = vmatprep.mubr.msk.f32.mxu0 %vm356_vm1, %v1388_v7 }
  0x9e   :  { %v766_v9 = vpop.permute.xlu1 %765  ;;  %v257_v14 = vpop.permute.xlu0 %256 }
  0x9f   :  { %vm866_vm5 = vcmp.eq.s32.totalorder %v766_v9, %v1954_v3  ;;  %vm309_vm6 = vcmp.eq.s32.totalorder %v257_v14, %v1954_v3 }
  0xa0   :  { %v1389_v15 = vsel %vm866_vm5, 1.0, %v1689_v12  ;;  %v1338_v2 = vsel %vm309_vm6, 1.0, %v1689_v12 }
  0xa1   :  { %1525 = vmatmul.mubr.msk.f32.gmra.mrb[8].mxu1 %vm356_vm1, %v1338_v2  ;;  %1589 = vmatmul.mubr.msk.f32.vlgmr.msra.gmra.mrb[0].mxu0 %vm356_vm1, %v1389_v15 }
  0xa2   :  { %v773_v5 = vpop.permute.xlu1 %772  ;;  %v264_v19 = vpop.permute.xlu0 %263 }
  0xa3   :  { %vm867_vm7 = vcmp.eq.s32.totalorder %v773_v5, %v1954_v3  ;;  %vm310_vm8 = vcmp.eq.s32.totalorder %v264_v19, %v1954_v3 }
  0xa4   :  { %v1390_v20 = vsel %vm867_vm7, 1.0, %v1689_v12  ;;  %v1339_v23 = vsel %vm310_vm8, 1.0, %v1689_v12 }
  0xa5   :  { %1527 = vmatprep.mubr.msk.f32.mxu1 %vm356_vm1, %v1339_v23  ;;  %1591 = vmatprep.mubr.msk.f32.mxu0 %vm356_vm1, %v1390_v20 }
  0xa6   :  { %v780_v24 = vpop.permute.xlu1 %779  ;;  %v271_v29 = vpop.permute.xlu0 %270 }
  0xa7   :  { %vm868_vm9 = vcmp.eq.s32.totalorder %v780_v24, %v1954_v3  ;;  %vm311_vm10 = vcmp.eq.s32.totalorder %v271_v29, %v1954_v3 }
  0xa8   :  { %v1391_v30 = vsel %vm868_vm9, 1.0, %v1689_v12  ;;  %v1340_v31 = vsel %vm311_vm10, 1.0, %v1689_v12 }
  0xa9   :  { %1528 = vmatmul.mubr.msk.f32.gmra.mrb[10].mxu1 %vm356_vm1, %v1340_v31  ;;  %1592 = vmatmul.mubr.msk.f32.gmra.mrb[2].mxu0 %vm356_vm1, %v1391_v30 }
  0xaa   :  { %v787_v36 = vpop.permute.xlu1 %786  ;;  %v278_v37 = vpop.permute.xlu0 %277 }
  0xab   :  { %vm869_vm11 = vcmp.eq.s32.totalorder %v787_v36, %v1954_v3  ;;  %vm312_vm12 = vcmp.eq.s32.totalorder %v278_v37, %v1954_v3 }
  0xac   :  { %v1392_v38 = vsel %vm869_vm11, 1.0, %v1689_v12  ;;  %v1341_v47 = vsel %vm312_vm12, 1.0, %v1689_v12 }
  0xad   :  { %1530 = vmatprep.mubr.msk.f32.mxu1 %vm356_vm1, %v1341_v47  ;;  %1594 = vmatprep.mubr.msk.f32.mxu0 %vm356_vm1, %v1392_v38 }
  0xae   :  { %v794_v49 = vpop.permute.xlu1 %793  ;;  %v285_v50 = vpop.permute.xlu0 %284 }
  0xaf   :  { %vm870_vm13 = vcmp.eq.s32.totalorder %v794_v49, %v1954_v3  ;;  %vm313_vm14 = vcmp.eq.s32.totalorder %v285_v50, %v1954_v3 }
  0xb0   :  { %v1393_v51 = vsel %vm870_vm13, 1.0, %v1689_v12  ;;  %v1342_v4 = vsel %vm313_vm14, 1.0, %v1689_v12 }
  0xb1   :  { %1531 = vmatmul.mubr.msk.f32.gmra.mrb[12].mxu1 %vm356_vm1, %v1342_v4  ;;  %1595 = vmatmul.mubr.msk.f32.gmra.mrb[4].mxu0 %vm356_vm1, %v1393_v51 }
  0xb2   :  { %v801_v10 = vpop.permute.xlu1 %800  ;;  %v292_v11 = vpop.permute.xlu0 %291 }
  0xb3   :  { %vm871_vm15 = vcmp.eq.s32.totalorder %v801_v10, %v1954_v3  ;;  %vm314_vm0 = vcmp.eq.s32.totalorder %v292_v11, %v1954_v3 }
  0xb4   :  { %v1394_v16 = vsel %vm871_vm15, 1.0, %v1689_v12  ;;  %v1343_v13 = vsel %vm314_vm0, 1.0, %v1689_v12 }
  0xb5   :  { %1533 = vmatprep.mubr.msk.f32.mxu1 %vm356_vm1, %v1343_v13  ;;  %1597 = vmatprep.mubr.msk.f32.mxu0 %vm356_vm1, %v1394_v16  ;;  %v2130_v16 = vld [vmem:[%s2170_s2] ss:$0 sm:$0xff] }
  0xb6   :  { %v808_v0 = vpop.permute.xlu1 %807  ;;  %v299_v17 = vpop.permute.xlu0 %298 }
  0xb7   :  { %vm872_vm2 = vcmp.eq.s32.totalorder %v808_v0, %v1954_v3  ;;  %vm315_vm3 = vcmp.eq.s32.totalorder %v299_v17, %v1954_v3 }
  0xb8   :  { %v1395_v18 = vsel %vm872_vm2, 1.0, %v1689_v12  ;;  %v1344_v21 = vsel %vm315_vm3, 1.0, %v1689_v12 }
  0xb9   :  { %1534 = vmatmul.mubr.msk.f32.gmra.mrb[14].mxu1 %vm356_vm1, %v1344_v21  ;;  %1598 = vmatmul.mubr.msk.f32.gmra.mrb[6].mxu0 %vm356_vm1, %v1395_v18 }
  0xba   :  { %v815_v22 = vpop.permute.xlu1 %814  ;;  %v80_v25 = vpop.permute.xlu0 %79 }
  0xbb   :  { %vm873_vm4 = vcmp.eq.s32.totalorder %v815_v22, %v1954_v3  ;;  %vm138_vm5 = vcmp.eq.s32.totalorder %v80_v25, %v1954_v3 }
  0xbc   :  { %v1396_v26 = vsel %vm873_vm4, 1.0, %v1689_v12  ;;  %v1319_v27 = vsel %vm138_vm5, 1.0, %v1689_v12  ;;  %vm1272_vm5 = vcmask 1042434  }
  0xbd   :  { %1562 = vmatprep.mubr.msk.f32.mxu1 %vm356_vm1, %v1319_v27  ;;  %1600 = vmatprep.mubr.msk.f32.mxu0 %vm356_vm1, %v1396_v26 }
  0xbe   :  { %v822_v28 = vpop.permute.xlu1 %821  ;;  %v87_v32 = vpop.permute.xlu0 %86 }
  0xbf   :  { %vm874_vm6 = vcmp.eq.s32.totalorder %v822_v28, %v1954_v3  ;;  %vm139_vm7 = vcmp.eq.s32.totalorder %v87_v32, %v1954_v3 }
  0xc0   :  { %v1397_v33 = vsel %vm874_vm6, 1.0, %v1689_v12  ;;  %v1320_v34 = vsel %vm139_vm7, 1.0, %v1689_v12  ;;  %vm1275_vm6 = vcmask 1043459   ;;  %vm1278_vm7 = vcmask 1044484  }
  0xc1   :  { %1563 = vmatmul.mubr.msk.f32.vlgmr.msra.gmra.mrb[8].mxu1 %vm356_vm1, %v1320_v34  ;;  %1601 = vmatmul.mubr.msk.f32.gmra.mrb[8].mxu0 %vm356_vm1, %v1397_v33 }
  0xc2   :  { %v829_v35 = vpop.permute.xlu1 %828  ;;  %v94_v39 = vpop.permute.xlu0 %93 }
  0xc3   :  { %vm875_vm8 = vcmp.eq.s32.totalorder %v829_v35, %v1954_v3  ;;  %vm140_vm9 = vcmp.eq.s32.totalorder %v94_v39, %v1954_v3 }
  0xc4   :  { %v1398_v40 = vsel %vm875_vm8, 1.0, %v1689_v12  ;;  %v1321_v41 = vsel %vm140_vm9, 1.0, %v1689_v12  ;;  %vm1281_vm8 = vcmask 1045509   ;;  %vm1284_vm9 = vcmask 1046534  }
  0xc5   :  { %1565 = vmatprep.mubr.msk.f32.mxu1 %vm356_vm1, %v1321_v41  ;;  %1603 = vmatprep.mubr.msk.f32.mxu0 %vm356_vm1, %v1398_v40 }
  0xc6   :  { %v836_v42 = vpop.permute.xlu1 %835  ;;  %v101_v43 = vpop.permute.xlu0 %100 }
  0xc7   :  { %vm876_vm10 = vcmp.eq.s32.totalorder %v836_v42, %v1954_v3  ;;  %vm141_vm11 = vcmp.eq.s32.totalorder %v101_v43, %v1954_v3 }
  0xc8   :  { %v1399_v44 = vsel %vm876_vm10, 1.0, %v1689_v12  ;;  %v1322_v45 = vsel %vm141_vm11, 1.0, %v1689_v12  ;;  %vm1287_vm10 = vcmask 1047559  }
  0xc9   :  { %1566 = vmatmul.mubr.msk.f32.gmra.mrb[10].mxu1 %vm356_vm1, %v1322_v45  ;;  %1604 = vmatmul.mubr.msk.f32.gmra.mrb[10].mxu0 %vm356_vm1, %v1399_v44 }
  0xca   :  { %v843_v46 = vpop.permute.xlu1 %842  ;;  %v108_v48 = vpop.permute.xlu0 %107 }
  0xcb   :  { %vm877_vm12 = vcmp.eq.s32.totalorder %v843_v46, %v1954_v3  ;;  %vm142_vm13 = vcmp.eq.s32.totalorder %v108_v48, %v1954_v3 }
  0xcc   :  { %v1400_v52 = vsel %vm877_vm12, 1.0, %v1689_v12  ;;  %v1323_v53 = vsel %vm142_vm13, 1.0, %v1689_v12 }
  0xcd   :  { %1568 = vmatprep.mubr.msk.f32.mxu1 %vm356_vm1, %v1323_v53  ;;  %1606 = vmatprep.mubr.msk.f32.mxu0 %vm356_vm1, %v1400_v52 }
  0xce   :  { %v850_v54 = vpop.permute.xlu1 %849  ;;  %v115_v55 = vpop.permute.xlu0 %114 }
  0xcf   :  { %vm878_vm14 = vcmp.eq.s32.totalorder %v850_v54, %v1954_v3  ;;  %vm143_vm15 = vcmp.eq.s32.totalorder %v115_v55, %v1954_v3 }
  0xd0   :  { %v1401_v56 = vsel %vm878_vm14, 1.0, %v1689_v12  ;;  %v1324_v57 = vsel %vm143_vm15, 1.0, %v1689_v12 }
  0xd1   :  { %1569 = vmatmul.mubr.msk.f32.gmra.mrb[12].mxu1 %vm356_vm1, %v1324_v57  ;;  %1607 = vmatmul.mubr.msk.f32.gmra.mrb[12].mxu0 %vm356_vm1, %v1401_v56 }
  0xd2   :  { %v857_v58 = vpop.permute.xlu1 %856  ;;  %v122_v59 = vpop.permute.xlu0 %121 }
  0xd3   :  { %vm879_vm0 = vcmp.eq.s32.totalorder %v857_v58, %v1954_v3  ;;  %vm144_vm2 = vcmp.eq.s32.totalorder %v122_v59, %v1954_v3 }
  0xd4   :  { %v1402_v60 = vsel %vm879_vm0, 1.0, %v1689_v12  ;;  %v1325_v61 = vsel %vm144_vm2, 1.0, %v1689_v12 }
  0xd5   :  { %1571 = vmatprep.mubr.msk.f32.mxu1 %vm356_vm1, %v1325_v61  ;;  %1609 = vmatprep.mubr.msk.f32.mxu0 %vm356_vm1, %v1402_v60 }
  0xd6   :  { %v864_v62 = vpop.permute.xlu1 %863  ;;  %v129_v63 = vpop.permute.xlu0 %128 }
  0xd7   :  { %vm880_vm3 = vcmp.eq.s32.totalorder %v864_v62, %v1954_v3  ;;  %vm145_vm4 = vcmp.eq.s32.totalorder %v129_v63, %v1954_v3 }
  0xd8   :  { %v1403_v1 = vsel %vm880_vm3, 1.0, %v1689_v12  ;;  %v1326_v6 = vsel %vm145_vm4, 1.0, %v1689_v12 }
  0xd9   :  { %1572 = vmatmul.mubr.msk.f32.gmra.mrb[14].mxu1 %vm356_vm1, %v1326_v6  ;;  %1610 = vmatmul.mubr.msk.f32.gmra.mrb[14].mxu0 %vm356_vm1, %v1403_v1  ;;  %vm1269_vm1 = vcmask 1041409  }
 0x155   :  { %v1514_v7 = vpop.f32.mrb[0].mxu1 }
 0x156   :  { %v475_v8 = vpop.f32.mrb[1].mxu1 }
 0x15c   :  { %v1517_v9 = vpop.f32.mrb[2].mxu1 }
 0x15d   :  { %v485_v14 = vpop.f32.mrb[3].mxu1 }
 0x164   :  { %v1520_v15 = vpop.f32.mrb[4].mxu1 }
 0x165   :  { %v495_v2 = vpop.f32.mrb[5].mxu1 }
 0x16c   :  { %v1523_v5 = vpop.f32.mrb[6].mxu1 }
 0x16d   :  { %v505_v19 = vpop.f32.mrb[7].mxu1 }
 0x174   :  { %v1590_v20 = vpop.f32.mrb[0].mxu0 }
 0x175   :  { %v1656_v23 = vadd.f32 %v1590_v20, %v1514_v7  ;;  %v1038_v24 = vpop.f32.mrb[1].mxu0 }
 0x176   :  { %v1657_v3 = vadd.f32 %v1038_v24, %v475_v8 }
 0x177   :  { %v1139_v29 = vrot.slane %v1656_v23, 4 }
 0x178   :  { %v1133_v30 = vrot.slane %v1657_v3, 4 }
 0x179   :  { %v1140_v31 = vmax.f32 %v1656_v23, %v1139_v29 }
 0x17a   :  { %v1134_v12 = vmax.f32 %v1657_v3, %v1133_v30 }
 0x17b   :  { %v1141_v36 = vrot.slane %v1140_v31, 2 }
 0x17c   :  { %v1135_v37 = vrot.slane %v1134_v12, 2  ;;  %v1593_v38 = vpop.f32.mrb[2].mxu0 }
 0x17d   :  { %v1142_v47 = vmax.f32 %v1140_v31, %v1141_v36  ;;  %v1658_v49 = vadd.f32 %v1593_v38, %v1517_v9  ;;  %v1048_v50 = vpop.f32.mrb[3].mxu0 }
 0x17e   :  { %v1136_v51 = vmax.f32 %v1134_v12, %v1135_v37  ;;  %v1659_v4 = vadd.f32 %v1048_v50, %v485_v14 }
 0x17f   :  { %v1143_v10 = vrot.slane %v1142_v47, 1  ;;  %v1151_v11 = vrot.slane %v1658_v49, 4 }
 0x180   :  { %v1137_v13 = vrot.slane %v1136_v51, 1  ;;  %v1145_v0 = vrot.slane %v1659_v4, 4 }
 0x181   :  { %v1144_v17 = vmax.f32 %v1142_v47, %v1143_v10  ;;  %v1152_v18 = vmax.f32 %v1658_v49, %v1151_v11 }
 0x182   :  { %v1138_v21 = vmax.f32 %v1136_v51, %v1137_v13  ;;  %v1146_v22 = vmax.f32 %v1659_v4, %v1145_v0 }
 0x183   :  { %v1237_v25 = vadd.f32 %v2130_v16, %v1144_v17  ;;  %v1153_v26 = vrot.slane %v1152_v18, 2 }
 0x184   :  { %v1236_v27 = vadd.f32 %v2130_v16, %v1138_v21  ;;  %v1147_v28 = vrot.slane %v1146_v22, 2  ;;  %v1596_v32 = vpop.f32.mrb[4].mxu0 }
 0x185   :  { %v1268_v33 = vrot.slane %v1237_v25, 7  ;;  %v1154_v34 = vmax.f32 %v1152_v18, %v1153_v26  ;;  %v1660_v35 = vadd.f32 %v1596_v32, %v1520_v15  ;;  %v1058_v39 = vpop.f32.mrb[5].mxu0 }
 0x186   :  { %v1148_v40 = vmax.f32 %v1146_v22, %v1147_v28  ;;  %v1661_v41 = vadd.f32 %v1058_v39, %v495_v2 }
 0x187   :  { %v1270_v42 = vsel %vm1269_vm1, %v1268_v33, %v1236_v27  ;;  %v1155_v43 = vrot.slane %v1154_v34, 1  ;;  %v1163_v44 = vrot.slane %v1660_v35, 4 }
 0x188   :  { %v1149_v45 = vrot.slane %v1148_v40, 1  ;;  %v1157_v46 = vrot.slane %v1661_v41, 4 }
 0x189   :  { %v1156_v48 = vmax.f32 %v1154_v34, %v1155_v43  ;;  %v1164_v52 = vmax.f32 %v1660_v35, %v1163_v44 }
 0x18a   :  { %v1150_v53 = vmax.f32 %v1148_v40, %v1149_v45  ;;  %v1158_v54 = vmax.f32 %v1661_v41, %v1157_v46 }
 0x18b   :  { %v1239_v55 = vadd.f32 %v2130_v16, %v1156_v48  ;;  %v1165_v56 = vrot.slane %v1164_v52, 2 }
 0x18c   :  { %v1238_v57 = vadd.f32 %v2130_v16, %v1150_v53  ;;  %v1159_v58 = vrot.slane %v1158_v54, 2  ;;  %v1599_v59 = vpop.f32.mrb[6].mxu0 }
 0x18d   :  { %v1166_v60 = vmax.f32 %v1164_v52, %v1165_v56  ;;  %v1662_v61 = vadd.f32 %v1599_v59, %v1523_v5  ;;  %v1068_v62 = vpop.f32.mrb[7].mxu0  ;;  %v1274_v7 = vrot.slane %v1239_v55, 5 }
 0x18e   :  { %v1271_v63 = vrot.slane %v1238_v57, 6  ;;  %v1160_v1 = vmax.f32 %v1158_v54, %v1159_v58  ;;  %v1663_v6 = vadd.f32 %v1068_v62, %v505_v19 }
 0x18f   :  { %v1167_v8 = vrot.slane %v1166_v60, 1  ;;  %v1175_v9 = vrot.slane %v1662_v61, 4 }
 0x190   :  { %v1273_v14 = vsel %vm1272_vm5, %v1271_v63, %v1270_v42  ;;  %v1161_v15 = vrot.slane %v1160_v1, 1  ;;  %v1169_v2 = vrot.slane %v1663_v6, 4 }
 0x191   :  { %v1168_v20 = vmax.f32 %v1166_v60, %v1167_v8  ;;  %v1276_v23 = vsel %vm1275_vm6, %v1274_v7, %v1273_v14  ;;  %v1176_v24 = vmax.f32 %v1662_v61, %v1175_v9 }
 0x192   :  { %v1162_v3 = vmax.f32 %v1160_v1, %v1161_v15  ;;  %v1170_v29 = vmax.f32 %v1663_v6, %v1169_v2 }
 0x193   :  { %v1241_v5 = vadd.f32 %v2130_v16, %v1168_v20  ;;  %v1177_v30 = vrot.slane %v1176_v24, 2 }
 0x194   :  { %v1240_v31 = vadd.f32 %v2130_v16, %v1162_v3  ;;  %v1171_v12 = vrot.slane %v1170_v29, 2  ;;  %v1564_v19 = vpop.f32.mrb[8].mxu1  ;;  %v1602_v36 = vpop.f32.mrb[8].mxu0 }
 0x195   :  { %v1178_v37 = vmax.f32 %v1176_v24, %v1177_v30  ;;  %v1664_v38 = vadd.f32 %v1602_v36, %v1564_v19  ;;  %v711_v47 = vpop.f32.mrb[9].mxu1  ;;  %v1078_v49 = vpop.f32.mrb[9].mxu0  ;;  %v1280_v10 = vrot.slane %v1241_v5, 3 }
 0x196   :  { %v1277_v50 = vrot.slane %v1240_v31, 4  ;;  %v1172_v51 = vmax.f32 %v1170_v29, %v1171_v12  ;;  %v1665_v4 = vadd.f32 %v1078_v49, %v711_v47 }
 0x197   :  { %v1179_v11 = vrot.slane %v1178_v37, 1  ;;  %v1187_v13 = vrot.slane %v1664_v38, 4 }
 0x198   :  { %v1279_v0 = vsel %vm1278_vm7, %v1277_v50, %v1276_v23  ;;  %v1173_v17 = vrot.slane %v1172_v51, 1  ;;  %v1181_v18 = vrot.slane %v1665_v4, 4 }
 0x199   :  { %v1180_v21 = vmax.f32 %v1178_v37, %v1179_v11  ;;  %v1282_v22 = vsel %vm1281_vm8, %v1280_v10, %v1279_v0  ;;  %v1188_v25 = vmax.f32 %v1664_v38, %v1187_v13 }
 0x19a   :  { %v1174_v26 = vmax.f32 %v1172_v51, %v1173_v17  ;;  %v1182_v27 = vmax.f32 %v1665_v4, %v1181_v18 }
 0x19b   :  { %v1243_v28 = vadd.f32 %v2130_v16, %v1180_v21  ;;  %v1189_v32 = vrot.slane %v1188_v25, 2 }
 0x19c   :  { %v1242_v33 = vadd.f32 %v2130_v16, %v1174_v26  ;;  %v1183_v34 = vrot.slane %v1182_v27, 2  ;;  %v1567_v35 = vpop.f32.mrb[10].mxu1  ;;  %v1605_v39 = vpop.f32.mrb[10].mxu0 }
 0x19d   :  { %v1190_v40 = vmax.f32 %v1188_v25, %v1189_v32  ;;  %v1666_v41 = vadd.f32 %v1605_v39, %v1567_v35  ;;  %v721_v42 = vpop.f32.mrb[11].mxu1  ;;  %v1088_v43 = vpop.f32.mrb[11].mxu0  ;;  %v1286_v48 = vrot.slane %v1243_v28, 1 }
 0x19e   :  { %v1283_v44 = vrot.slane %v1242_v33, 2  ;;  %v1184_v45 = vmax.f32 %v1182_v27, %v1183_v34  ;;  %v1667_v46 = vadd.f32 %v1088_v43, %v721_v42 }
 0x19f   :  { %v1191_v52 = vrot.slane %v1190_v40, 1  ;;  %v1199_v53 = vrot.slane %v1666_v41, 4 }
 0x1a0   :  { %v1285_v54 = vsel %vm1284_vm9, %v1283_v44, %v1282_v22  ;;  %v1185_v55 = vrot.slane %v1184_v45, 1  ;;  %v1193_v56 = vrot.slane %v1667_v46, 4 }
 0x1a1   :  { %v1288_v57 = vsel %vm1287_vm10, %v1286_v48, %v1285_v54  ;;  %v1192_v58 = vmax.f32 %v1190_v40, %v1191_v52  ;;  %v1200_v59 = vmax.f32 %v1666_v41, %v1199_v53 }
 0x1a2   :  { %1305 = vst [vmem:[%s2171_s3] sm:$0xff] %v1288_v57  ;;  %v1186_v60 = vmax.f32 %v1184_v45, %v1185_v55  ;;  %v1194_v61 = vmax.f32 %v1667_v46, %v1193_v56 }
 0x1a3   :  { %v1245_v62 = vadd.f32 %v2130_v16, %v1192_v58  ;;  %v1201_v63 = vrot.slane %v1200_v59, 2 }
 0x1a4   :  { %v1244_v1 = vadd.f32 %v2130_v16, %v1186_v60  ;;  %v1195_v6 = vrot.slane %v1194_v61, 2  ;;  %v1570_v7 = vpop.f32.mrb[12].mxu1  ;;  %v1608_v8 = vpop.f32.mrb[12].mxu0 }
 0x1a5   :  { %v1289_v9 = vrot.slane %v1245_v62, 7  ;;  %v1202_v14 = vmax.f32 %v1200_v59, %v1201_v63  ;;  %v1668_v15 = vadd.f32 %v1608_v8, %v1570_v7  ;;  %v731_v2 = vpop.f32.mrb[13].mxu1  ;;  %v1098_v20 = vpop.f32.mrb[13].mxu0 }
 0x1a6   :  { %v1196_v23 = vmax.f32 %v1194_v61, %v1195_v6  ;;  %v1669_v24 = vadd.f32 %v1098_v20, %v731_v2 }
 0x1a7   :  { %v1290_v3 = vsel %vm1269_vm1, %v1289_v9, %v1244_v1  ;;  %v1203_v29 = vrot.slane %v1202_v14, 1  ;;  %v1211_v5 = vrot.slane %v1668_v15, 4 }
 0x1a8   :  { %v1197_v30 = vrot.slane %v1196_v23, 1  ;;  %v1205_v31 = vrot.slane %v1669_v24, 4 }
 0x1a9   :  { %v1204_v12 = vmax.f32 %v1202_v14, %v1203_v29  ;;  %v1212_v19 = vmax.f32 %v1668_v15, %v1211_v5 }
 0x1aa   :  { %v1198_v36 = vmax.f32 %v1196_v23, %v1197_v30  ;;  %v1206_v37 = vmax.f32 %v1669_v24, %v1205_v31 }
 0x1ab   :  { %v1247_v38 = vadd.f32 %v2130_v16, %v1204_v12  ;;  %v1213_v47 = vrot.slane %v1212_v19, 2 }
 0x1ac   :  { %v1246_v49 = vadd.f32 %v2130_v16, %v1198_v36  ;;  %v1207_v50 = vrot.slane %v1206_v37, 2  ;;  %v1573_v51 = vpop.f32.mrb[14].mxu1  ;;  %v1611_v4 = vpop.f32.mrb[14].mxu0 }
 0x1ad   :  { %v1214_v10 = vmax.f32 %v1212_v19, %v1213_v47  ;;  %v1670_v11 = vadd.f32 %v1611_v4, %v1573_v51  ;;  %v741_v13 = vpop.f32.mrb[15].mxu1  ;;  %v1108_v0 = vpop.f32.mrb[15].mxu0  ;;  %v1293_v22 = vrot.slane %v1247_v38, 5 }
 0x1ae   :  { %v1291_v17 = vrot.slane %v1246_v49, 6  ;;  %v1208_v18 = vmax.f32 %v1206_v37, %v1207_v50  ;;  %v1671_v21 = vadd.f32 %v1108_v0, %v741_v13 }
 0x1af   :  { %v1215_v25 = vrot.slane %v1214_v10, 1  ;;  %v1223_v26 = vrot.slane %v1670_v11, 4 }
 0x1b0   :  { %v1292_v27 = vsel %vm1272_vm5, %v1291_v17, %v1290_v3  ;;  %v1209_v28 = vrot.slane %v1208_v18, 1  ;;  %v1217_v32 = vrot.slane %v1671_v21, 4 }
 0x1b1   :  { %v1216_v33 = vmax.f32 %v1214_v10, %v1215_v25  ;;  %v1294_v34 = vsel %vm1275_vm6, %v1293_v22, %v1292_v27  ;;  %v1224_v35 = vmax.f32 %v1670_v11, %v1223_v26 }
 0x1b2   :  { %v1210_v39 = vmax.f32 %v1208_v18, %v1209_v28  ;;  %v1218_v40 = vmax.f32 %v1671_v21, %v1217_v32 }
 0x1b3   :  { %v1249_v41 = vadd.f32 %v2130_v16, %v1216_v33  ;;  %v1225_v42 = vrot.slane %v1224_v35, 2 }
 0x1b4   :  { %v1248_v43 = vadd.f32 %v2130_v16, %v1210_v39  ;;  %v1219_v44 = vrot.slane %v1218_v40, 2 }
 0x1b5   :  { %v1226_v45 = vmax.f32 %v1224_v35, %v1225_v42  ;;  %v1297_v52 = vrot.slane %v1249_v41, 3 }
 0x1b6   :  { %v1295_v46 = vrot.slane %v1248_v43, 4  ;;  %v1220_v48 = vmax.f32 %v1218_v40, %v1219_v44 }
 0x1b7   :  { %v1227_v53 = vrot.slane %v1226_v45, 1 }
 0x1b8   :  { %v1296_v54 = vsel %vm1278_vm7, %v1295_v46, %v1294_v34  ;;  %v1221_v55 = vrot.slane %v1220_v48, 1 }
 0x1b9   :  { %v1228_v56 = vmax.f32 %v1226_v45, %v1227_v53  ;;  %v1298_v57 = vsel %vm1281_vm8, %v1297_v52, %v1296_v54 }
 0x1ba   :  { %v1222_v58 = vmax.f32 %v1220_v48, %v1221_v55 }
 0x1bb   :  { %v1251_v59 = vadd.f32 %v2130_v16, %v1228_v56 }
 0x1bc   :  { %v1250_v60 = vadd.f32 %v2130_v16, %v1222_v58 }
 0x1bd   :  { %v1301_v62 = vrot.slane %v1251_v59, 1 }
 0x1be   :  { %v1299_v61 = vrot.slane %v1250_v60, 2 }
 0x1c0   :  { %v1300_v63 = vsel %vm1284_vm9, %v1299_v61, %v1298_v57 }
 0x1c1   :  { %v1302_v1 = vsel %vm1287_vm10, %v1301_v62, %v1300_v63 }
 0x1c2   :  { %1306 = vst [vmem:[%s2171_s3 + $0x8] sm:$0xff] %v1302_v1 }

</bundles_post_ra>
